<compile_context>
chip_gen: v6e
topology: v6e:2x2x1
jax: 0.10.0
libtpu: 0.0.40
codegen_flags: <defaults>
</compile_context>

<pallas_src>
import jax
import jax.numpy as jnp
from jax.experimental import pallas as pl
from jax.experimental.pallas import tpu as pltpu


def _make_max_over_images_kernel(N: int, F: int, k: int):
    """Kernel over a (tG, k*N*F) input block -> (tG, k*F) output block."""

    def kernel(x_ref, o_ref):
        for j in range(k):                      # k folded batch rows per kernel row
            base = j * N * F
            acc = x_ref[:, base:base + F]
            for n in range(1, N):               # unrolled max tree over the N images
                off = base + n * F
                acc = jnp.maximum(acc, x_ref[:, off:off + F])
            o_ref[:, j * F:(j + 1) * F] = acc

    return kernel


def max_pool_images(x: jax.Array,
                    *,
                    vmem_budget_bytes: int = 20 * 1024 * 1024,
                    interpret: bool = False) -> jax.Array:
    """x: (B, nbr_images, F) -> (B, F); equivalent to MaxPoolImages.forward."""
    B, N, F = x.shape
    itemsize = jnp.dtype(x.dtype).itemsize

    # Fold k consecutive batch rows into one kernel row so the output row width k*F is
    # lane-dense (multiple of 128) when the shapes allow it.  Pure reshape, no transpose.
    k = 1
    if F % 128 != 0:
        for cand in range(2, 129):
            if (cand * F) % 128 == 0 and B % cand == 0 and cand * N <= 256:
                k = cand
                break

    G = B // k                  # kernel rows
    w_in = k * N * F            # input lane width per kernel row
    w_out = k * F               # output lane width per kernel row
    bytes_per_row = (w_in + w_out) * itemsize

    # Biggest row tile whose double-buffered (2x in + 2x out) footprint fits the budget.
    max_rows = max(1, vmem_budget_bytes // (2 * bytes_per_row))
    if max_rows >= G:
        tG = G                                     # single block over rows
    else:
        tG = min(G, max(8, (max_rows // 8) * 8))   # sublane-aligned row tile
    # (For extremely large F -- rows of multiple MiB -- lane-tiling F would be the next
    #  step; not needed for this module's shapes.)

    x2 = x.reshape(G, w_in)     # C-contiguous view of (B, N, F): no data movement

    out2 = pl.pallas_call(
        _make_max_over_images_kernel(N, F, k),
        out_shape=jax.ShapeDtypeStruct((G, w_out), x.dtype),
        grid=(pl.cdiv(G, tG),),
        in_specs=[pl.BlockSpec((tG, w_in), lambda i: (i, 0))],
        out_specs=pl.BlockSpec((tG, w_out), lambda i: (i, 0)),
        compiler_params=pltpu.CompilerParams(
            dimension_semantics=("parallel",),        # megacore split on v7x
            vmem_limit_bytes=32 * 1024 * 1024,        # raise v5e's 16 MiB default
        ),
        interpret=interpret,
    )(x2)

    return out2.reshape(B, F)


if __name__ == "__main__":
    key = jax.random.PRNGKey(0)

    # Shapes implied by the module: (batch, nbr_images=12, feature_dim).
    test_shapes = [
        (2, 12, 32),    # tiny demo shape (no batch fold possible; single block)
        (8, 12, 32),    # batch-fold path: k=4 -> lane-dense 128-wide output rows
        (16, 12, 256),  # feature dim already lane-dense
    ]

    for idx, (B, N, F) in enumerate(test_shapes):
        x = jax.random.normal(jax.random.fold_in(key, idx), (B, N, F),
                              dtype=jnp.float32)
        out = jax.block_until_ready(max_pool_images(x))
        ref = jnp.max(x, axis=1)  # same semantics as the PyTorch module
        assert out.shape == (B, F), (out.shape, (B, F))
        assert jnp.allclose(out, ref), f"mismatch vs reference at shape {(B, N, F)}"

    print("KERNEL_OK")
</pallas_src>

<mosaic_0001>
module attributes {stable_mosaic.version = 11 : i64} {
  func.func @kernel(%arg0: i32, %arg1: memref<2x384xf32, #tpu.memory_space<vmem>>, %arg2: memref<2x32xf32, #tpu.memory_space<vmem>>) attributes {dimension_semantics = [#tpu.dimension_semantics<parallel>], iteration_bounds = array<i64: 1>, scalar_prefetch = 0 : i64, scratch_operands = 0 : i64, tpu.core_type = #tpu.core_type<tc>, window_params = [{transform_indices = @transform_0, window_bounds = array<i64: 2, 384>}, {transform_indices = @transform_1, window_bounds = array<i64: 2, 32>}]} {
    %c0 = arith.constant 0 : index
    %c0_0 = arith.constant 0 : index
    %0 = vector.load %arg1[%c0, %c0_0] : memref<2x384xf32, #tpu.memory_space<vmem>>, vector<2x32xf32>
    %c0_1 = arith.constant 0 : index
    %c32 = arith.constant 32 : index
    %1 = vector.load %arg1[%c0_1, %c32] : memref<2x384xf32, #tpu.memory_space<vmem>>, vector<2x32xf32>
    %2 = arith.maximumf %0, %1 : vector<2x32xf32>
    %c0_2 = arith.constant 0 : index
    %c64 = arith.constant 64 : index
    %3 = vector.load %arg1[%c0_2, %c64] : memref<2x384xf32, #tpu.memory_space<vmem>>, vector<2x32xf32>
    %4 = arith.maximumf %2, %3 : vector<2x32xf32>
    %c0_3 = arith.constant 0 : index
    %c96 = arith.constant 96 : index
    %5 = vector.load %arg1[%c0_3, %c96] : memref<2x384xf32, #tpu.memory_space<vmem>>, vector<2x32xf32>
    %6 = arith.maximumf %4, %5 : vector<2x32xf32>
    %c0_4 = arith.constant 0 : index
    %c128 = arith.constant 128 : index
    %7 = vector.load %arg1[%c0_4, %c128] : memref<2x384xf32, #tpu.memory_space<vmem>>, vector<2x32xf32>
    %8 = arith.maximumf %6, %7 : vector<2x32xf32>
    %c0_5 = arith.constant 0 : index
    %c160 = arith.constant 160 : index
    %9 = vector.load %arg1[%c0_5, %c160] : memref<2x384xf32, #tpu.memory_space<vmem>>, vector<2x32xf32>
    %10 = arith.maximumf %8, %9 : vector<2x32xf32>
    %c0_6 = arith.constant 0 : index
    %c192 = arith.constant 192 : index
    %11 = vector.load %arg1[%c0_6, %c192] : memref<2x384xf32, #tpu.memory_space<vmem>>, vector<2x32xf32>
    %12 = arith.maximumf %10, %11 : vector<2x32xf32>
    %c0_7 = arith.constant 0 : index
    %c224 = arith.constant 224 : index
    %13 = vector.load %arg1[%c0_7, %c224] : memref<2x384xf32, #tpu.memory_space<vmem>>, vector<2x32xf32>
    %14 = arith.maximumf %12, %13 : vector<2x32xf32>
    %c0_8 = arith.constant 0 : index
    %c256 = arith.constant 256 : index
    %15 = vector.load %arg1[%c0_8, %c256] : memref<2x384xf32, #tpu.memory_space<vmem>>, vector<2x32xf32>
    %16 = arith.maximumf %14, %15 : vector<2x32xf32>
    %c0_9 = arith.constant 0 : index
    %c288 = arith.constant 288 : index
    %17 = vector.load %arg1[%c0_9, %c288] : memref<2x384xf32, #tpu.memory_space<vmem>>, vector<2x32xf32>
    %18 = arith.maximumf %16, %17 : vector<2x32xf32>
    %c0_10 = arith.constant 0 : index
    %c320 = arith.constant 320 : index
    %19 = vector.load %arg1[%c0_10, %c320] : memref<2x384xf32, #tpu.memory_space<vmem>>, vector<2x32xf32>
    %20 = arith.maximumf %18, %19 : vector<2x32xf32>
    %c0_11 = arith.constant 0 : index
    %c352 = arith.constant 352 : index
    %21 = vector.load %arg1[%c0_11, %c352] : memref<2x384xf32, #tpu.memory_space<vmem>>, vector<2x32xf32>
    %22 = arith.maximumf %20, %21 : vector<2x32xf32>
    %c0_12 = arith.constant 0 : index
    %c0_13 = arith.constant 0 : index
    %23 = vector.load %arg2[%c0_12, %c0_13] : memref<2x32xf32, #tpu.memory_space<vmem>>, vector<2x32xf32>
    tpu.vector_store %arg2[%c0_12, %c0_13], %22 {strides = array<i32>} : memref<2x32xf32, #tpu.memory_space<vmem>>, vector<2x32xf32>,
    return
  }
  func.func @transform_0(%arg0: i32) -> (i32, i32) {
    %c0_i32 = arith.constant 0 : i32
    %c0_i32_0 = arith.constant 0 : i32
    return %arg0, %c0_i32 : i32, i32
  }
  func.func @transform_1(%arg0: i32) -> (i32, i32) {
    %c0_i32 = arith.constant 0 : i32
    %c0_i32_0 = arith.constant 0 : i32
    return %arg0, %c0_i32 : i32, i32
  }
}

</mosaic_0001>

<bundles_post_ra>
// kernel: tpu_custom_call.1
= control target key start
LH: loop header
LB: loop body
LE: loop exit
PB: predicated region body
PF: predicated region fallthrough
CT: control target
= control target key end

     0   :  { %6 = vsyncpa [#allocation3], 0  ;;  %s152_s0 = inlined_call_operand.hbm [shape: f32[2,384], index: 0, kind: input, shape index: {}]   ;;  %s153_s1 = inlined_call_operand.hbm [shape: f32[2,32], index: 1, kind: output, shape index: {}]  }
   0x1   :  { %7 = vsyncpa [#allocation4], 0  ;;  %s131_s6 = smov [#allocation2]  }
   0x2   :  { %s14_s7 = sshll.u32 %s131_s6, 4  ;;  %s15_s7 = int_to_ptr.vmem [resolvable:$true] %s14_s7 }
   0x3   :  { %s95_s8 = scalar_lea.vmem %s15_s7, 96  ;;  %p100_p1 = scmp.lt.s32.totalorder %s15_s7, %s15_s7 }
   0x4   :  { %p96_p0 = scmp.ne.s32.totalorder %s15_s7, %s95_s8  ;;  %p101_p2 = scmp.lt.s32.totalorder %s95_s8, %s95_s8 }
   0x6   :  { %p102_p3 = por %p101_p2, %p100_p1 }
   0x8   :  { %p103_p4 = pnand %p102_p3, %p96_p0 }
   0xa   :  { %106 = shalt.err (!%p103_p4)
}
   0xb   :  { %17 = dma.hbm_to_vmem [thread:$0]  %s152_s0, 96, %s15_s7, [#allocation3]  }
   0xc   :  { %127 = dma.done.wait [#allocation3], 96  }
   0xd   :  { %128 = vsyncadd [#allocation3], 4294967200  ;;  %v21_v0 = vld [vmem:[#allocation2] sm:$0x3]  ;;  %s132_s11 = smov 96   ;;  %s133_s12 = smov 32  }
   0xe   :  { %23 = vrot.lane.b32.xlu0 %v21_v0, %s132_s11  ;;  %31 = vrot.lane.b32.xlu1 %v21_v0, %s133_s12  ;;  %v35_v1 = vld [vmem:[#allocation2 + $0x2] sm:$0x3]  ;;  %s134_s13 = smov 64   ;;  %v50_v2 = vld [vmem:[#allocation2 + $0x4] sm:$0x3]  ;;  %s135_s0 = smov [#allocation5]  }
   0xf   :  { %s73_s14 = sshll.u32 %s135_s0, 4  ;;  %vm65_vm0 = vcmask 254976   ;;  %s74_s14 = int_to_ptr.vmem [resolvable:$true] %s73_s14 }
  0x10   :  { %s107_s15 = scalar_lea.vmem %s74_s14, 32  ;;  %p112_p6 = scmp.lt.s32.totalorder %s74_s14, %s74_s14 }
  0x11   :  { %p108_p5 = scmp.ne.s32.totalorder %s74_s14, %s107_s15  ;;  %p113_p7 = scmp.lt.s32.totalorder %s107_s15, %s107_s15 }
  0x12   :  { %27 = vrot.lane.b32.xlu0 %v21_v0, %s134_s13  ;;  %38 = vrot.lane.b32.xlu1 %v35_v1, %s132_s11 }
  0x13   :  { %p114_p8 = por %p113_p7, %p112_p6 }
  0x15   :  { %p115_p9 = pnand %p114_p8, %p108_p5 }
  0x16   :  { %42 = vrot.lane.b32.xlu0 %v35_v1, %s134_s13  ;;  %46 = vrot.lane.b32.xlu1 %v35_v1, %s133_s12 }
  0x1a   :  { %53 = vrot.lane.b32.xlu0 %v50_v2, %s132_s11  ;;  %57 = vrot.lane.b32.xlu1 %v50_v2, %s134_s13 }
  0x1e   :  { %61 = vrot.lane.b32.xlu0 %v50_v2, %s133_s12 }
  0x80   :  { %v24_v3 = vpop.permute.xlu0 %23  ;;  %v32_v4 = vpop.permute.xlu1 %31 }
  0x81   :  { %v26_v5 = vmax.f32 %v21_v0, %v24_v3 }
  0x84   :  { %v28_v6 = vpop.permute.xlu0 %27  ;;  %v39_v8 = vpop.permute.xlu1 %38 }
  0x85   :  { %v30_v7 = vmax.f32 %v26_v5, %v28_v6 }
  0x87   :  { %v34_v9 = vmax.f32 %v30_v7, %v32_v4 }
  0x88   :  { %v43_v11 = vpop.permute.xlu0 %42  ;;  %v47_v13 = vpop.permute.xlu1 %46 }
  0x89   :  { %v36_v10 = vmax.f32 %v34_v9, %v35_v1 }
  0x8b   :  { %v41_v12 = vmax.f32 %v36_v10, %v39_v8 }
  0x8c   :  { %v54_v15 = vpop.permute.xlu0 %53  ;;  %v58_v18 = vpop.permute.xlu1 %57 }
  0x8d   :  { %v45_v14 = vmax.f32 %v41_v12, %v43_v11 }
  0x8f   :  { %v49_v16 = vmax.f32 %v45_v14, %v47_v13 }
  0x90   :  { %v62_v20 = vpop.permute.xlu0 %61 }
  0x91   :  { %v51_v17 = vmax.f32 %v49_v16, %v50_v2 }
  0x93   :  { %v56_v19 = vmax.f32 %v51_v17, %v54_v15 }
  0x95   :  { %v60_v21 = vmax.f32 %v56_v19, %v58_v18 }
  0x97   :  { %v64_v22 = vmax.f32 %v60_v21, %v62_v20 }
  0x99   :  { %66 = vst.msk [vmem:[#allocation5] sm:$0x3] %vm65_vm0, %v64_v22 }
  0x9a   :  { %118 = shalt.err (!%p115_p9)
}
  0x9b   :  { %76 = dma.vmem_to_hbm [thread:$0]  %s74_s14, 32, %s153_s1, [#allocation4]  }
  0x9c   :  { %129 = dma.done.wait [#allocation4], 32  }
  0x9d   :  { %130 = vsyncadd [#allocation4], 4294967264 }
  0x9e   :  { %80 = vsyncpa [#allocation3], 1 }
  0x9f   :  { %81 = vsyncpa [#allocation4], 1 }

</bundles_post_ra>
